<compile_context>
chip_gen: v7x
topology: tpu7x:2x2x1
jax: 0.10.0
libtpu: 0.0.40
codegen_flags: <defaults>
</compile_context>

<pallas_src>
import jax
import jax.numpy as jnp
from jax.experimental import pallas as pl
from jax.experimental.pallas import tpu as pltpu


def _round_up(x: int, m: int) -> int:
    return ((x + m - 1) // m) * m


def actor_kernel(state_ref, w1_ref, b1_ref, w2_ref, b2_ref, w3_ref, b3_ref,
                 out_ref):
    # In-kernel bf16 cast of the state (free under the MXU; no extra HBM pass).
    x = state_ref[...].astype(jnp.bfloat16)

    # fc1 + ReLU, fused with the bf16 downcast (keeps live intermediates small).
    h1 = jnp.maximum(
        jnp.dot(x, w1_ref[...], preferred_element_type=jnp.float32)
        + b1_ref[...], 0.0).astype(jnp.bfloat16)

    # fc2 + ReLU (same fusion).
    h2 = jnp.maximum(
        jnp.dot(h1, w2_ref[...], preferred_element_type=jnp.float32)
        + b2_ref[...], 0.0).astype(jnp.bfloat16)

    # fc3 + tanh (EUP); output lanes are 128-padded -> lane-dense stores.
    a = jnp.dot(h2, w3_ref[...], preferred_element_type=jnp.float32) + b3_ref[...]
    out_ref[...] = jnp.tanh(a).astype(out_ref.dtype)


def _choose_batch_tile(B: int, block_b: int) -> int:
    """Pick a sublane-aligned batch tile.

    Small batches: smallest 16-row-aligned tile covering the batch (bf16 packs
    16 rows per vreg).  Large batches: cap at block_b, but guarantee >= 2 grid
    steps so the "parallel" batch axis can shard across both TCs on v7x.
    """
    b_aligned = _round_up(B, 16)
    if b_aligned < 256:
        return b_aligned
    return min(block_b, _round_up(pl.cdiv(b_aligned, 2), 128))


def _vmem_bytes_estimate(TB, S, F1p, F2p, Ap):
    weights = 2 * (S * F1p + F1p * F2p + F2p * Ap)   # bf16, single-buffered
    biases = 4 * (F1p + F2p + Ap)                    # f32, single-buffered
    state = 2 * TB * S * 4                           # f32, double-buffered
    out = 2 * TB * Ap * 4                            # f32, double-buffered
    live = TB * (F1p + F2p) * 4                      # f32 matmul results
    return weights + biases + state + out + live


def actor_forward(state, params, action_size, block_b: int = 512,
                  out_dtype=jnp.float32):
    """state: [B, state_size] f32 -> actions: [B, action_size]."""
    w1, b1, w2, b2, w3, b3 = params
    B, S = state.shape
    F1p = w1.shape[1]
    F2p = w2.shape[1]
    Ap = w3.shape[1]

    TB = _choose_batch_tile(B, block_b)
    grid = (pl.cdiv(B, TB),)   # ragged last tile -> Pallas masked stores

    flops = 2 * B * (S * F1p + F1p * F2p + F2p * Ap)
    bytes_accessed = int(
        state.size * state.dtype.itemsize
        + w1.size * w1.dtype.itemsize + w2.size * w2.dtype.itemsize
        + w3.size * w3.dtype.itemsize
        + b1.size * b1.dtype.itemsize + b2.size * b2.dtype.itemsize
        + b3.size * b3.dtype.itemsize
        + B * Ap * jnp.dtype(out_dtype).itemsize)

    # Explicit VMEM limit only when the tile would outgrow the smallest scoped
    # default (v5e: 16 MiB); leave headroom, stay below v7x's 64 MiB physical.
    vmem_needed = _vmem_bytes_estimate(TB, S, F1p, F2p, Ap)
    vmem_limit = None
    if 2 * vmem_needed > (16 << 20):
        vmem_limit = int(min(2 * vmem_needed, 60 << 20))

    vmem = pltpu.MemorySpace.VMEM
    single = pl.Buffered(1)   # invariant operands: no pointless double-buffer

    out = pl.pallas_call(
        actor_kernel,
        out_shape=jax.ShapeDtypeStruct((B, Ap), out_dtype),
        grid=grid,
        in_specs=[
            # state: tiled over batch (f32; cast to bf16 inside the kernel)
            pl.BlockSpec((TB, S), lambda i: (i, 0), memory_space=vmem),
            # weights / biases: constant block -> VMEM-resident, single-buffered
            pl.BlockSpec((S, F1p), lambda i: (0, 0), memory_space=vmem,
                         pipeline_mode=single),
            pl.BlockSpec((1, F1p), lambda i: (0, 0), memory_space=vmem,
                         pipeline_mode=single),
            pl.BlockSpec((F1p, F2p), lambda i: (0, 0), memory_space=vmem,
                         pipeline_mode=single),
            pl.BlockSpec((1, F2p), lambda i: (0, 0), memory_space=vmem,
                         pipeline_mode=single),
            pl.BlockSpec((F2p, Ap), lambda i: (0, 0), memory_space=vmem,
                         pipeline_mode=single),
            pl.BlockSpec((1, Ap), lambda i: (0, 0), memory_space=vmem,
                         pipeline_mode=single),
        ],
        out_specs=pl.BlockSpec((TB, Ap), lambda i: (i, 0), memory_space=vmem),
        compiler_params=pltpu.CompilerParams(
            dimension_semantics=("parallel",),
            vmem_limit_bytes=vmem_limit),
        cost_estimate=pl.CostEstimate(
            flops=int(flops),
            transcendentals=int(B * Ap),
            bytes_accessed=bytes_accessed),
    )(state, w1, b1, w2, b2, w3, b3)

    # Strip the zero-filled action lanes (exact: padded cols/rows/bias are 0).
    return out[:, :action_size]


def init_actor_params(key, state_size, action_size,
                      fc1_units=400, fc2_units=300):
    """Synthetic init matching the PyTorch module's shapes/ranges.

    Weights are stored pre-transposed ([in, out]) so the kernel does x @ W.
    Hidden and action widths are zero-padded to multiples of 128 lanes; the
    padding (weight cols, next-layer rows, bias lanes) is all-zero so results
    are exact after slicing off the extra lanes.
    PyTorch's hidden_init uses lim = 1/sqrt(weight.size(0)) = 1/sqrt(out).
    """
    F1p = _round_up(fc1_units, 128)
    F2p = _round_up(fc2_units, 128)
    Ap = _round_up(action_size, 128)

    k1, k2, k3, kb1, kb2, kb3 = jax.random.split(key, 6)
    lim1 = 1.0 / float(jnp.sqrt(jnp.float32(fc1_units)))
    lim2 = 1.0 / float(jnp.sqrt(jnp.float32(fc2_units)))
    lim3 = 0.003

    def pad2(a, rows, cols):
        return jnp.pad(a, ((0, rows - a.shape[0]), (0, cols - a.shape[1])))

    w1 = jax.random.uniform(k1, (state_size, fc1_units),
                            minval=-lim1, maxval=lim1, dtype=jnp.float32)
    b1 = jax.random.uniform(kb1, (1, fc1_units),
                            minval=-lim1, maxval=lim1, dtype=jnp.float32)
    w2 = jax.random.uniform(k2, (fc1_units, fc2_units),
                            minval=-lim2, maxval=lim2, dtype=jnp.float32)
    b2 = jax.random.uniform(kb2, (1, fc2_units),
                            minval=-lim2, maxval=lim2, dtype=jnp.float32)
    w3 = jax.random.uniform(k3, (fc2_units, action_size),
                            minval=-lim3, maxval=lim3, dtype=jnp.float32)
    b3 = jax.random.uniform(kb3, (1, action_size),
                            minval=-lim3, maxval=lim3, dtype=jnp.float32)

    w1 = pad2(w1, state_size, F1p).astype(jnp.bfloat16)
    b1 = pad2(b1, 1, F1p)                                   # f32
    w2 = pad2(w2, F1p, F2p).astype(jnp.bfloat16)
    b2 = pad2(b2, 1, F2p)                                   # f32
    w3 = pad2(w3, F2p, Ap).astype(jnp.bfloat16)
    b3 = pad2(b3, 1, Ap)                                    # f32

    return (w1, b1, w2, b2, w3, b3)


def actor_reference(state, params, action_size):
    """Pure-JAX reference with identical precision (bf16 matmul, f32 acc)."""
    w1, b1, w2, b2, w3, b3 = params
    x = state.astype(jnp.bfloat16)
    h1 = jnp.maximum(
        jnp.dot(x, w1, preferred_element_type=jnp.float32) + b1,
        0.0).astype(jnp.bfloat16)
    h2 = jnp.maximum(
        jnp.dot(h1, w2, preferred_element_type=jnp.float32) + b2,
        0.0).astype(jnp.bfloat16)
    a = jnp.dot(h2, w3, preferred_element_type=jnp.float32) + b3
    return jnp.tanh(a)[:, :action_size]


if __name__ == "__main__":
    # Small, forward-consistent shapes (scaled-down fc1/fc2).
    state_size = 32
    action_size = 8
    fc1_units = 64
    fc2_units = 48

    key = jax.random.PRNGKey(0)
    kp, ks1, ks2 = jax.random.split(key, 3)

    params = init_actor_params(kp, state_size, action_size,
                               fc1_units=fc1_units, fc2_units=fc2_units)

    # Aligned small batch.
    state = jax.random.normal(ks1, (16, state_size), dtype=jnp.float32)
    actions = jax.block_until_ready(actor_forward(state, params, action_size))
    ref = actor_reference(state, params, action_size)
    assert actions.shape == (16, action_size)
    assert bool(jnp.all(jnp.abs(actions) <= 1.0 + 1e-6))
    assert jnp.allclose(actions, ref, atol=1e-2, rtol=1e-2)

    # Ragged batch (exercises the masked last-tile store path, no jnp.pad).
    state2 = jax.random.normal(ks2, (20, state_size), dtype=jnp.float32)
    actions2 = jax.block_until_ready(actor_forward(state2, params, action_size))
    ref2 = actor_reference(state2, params, action_size)
    assert actions2.shape == (20, action_size)
    assert jnp.allclose(actions2, ref2, atol=1e-2, rtol=1e-2)

    print("KERNEL_OK")
</pallas_src>

<mosaic_0001>
module attributes {stable_mosaic.version = 11 : i64} {
  func.func @actor_kernel(%arg0: i32, %arg1: memref<16x32xf32, #tpu.memory_space<vmem>>, %arg2: memref<32x128xbf16, #tpu.memory_space<vmem>>, %arg3: memref<1x128xf32, #tpu.memory_space<vmem>>, %arg4: memref<128x128xbf16, #tpu.memory_space<vmem>>, %arg5: memref<1x128xf32, #tpu.memory_space<vmem>>, %arg6: memref<128x128xbf16, #tpu.memory_space<vmem>>, %arg7: memref<1x128xf32, #tpu.memory_space<vmem>>, %arg8: memref<16x128xf32, #tpu.memory_space<vmem>>) attributes {dimension_semantics = [#tpu.dimension_semantics<parallel>], iteration_bounds = array<i64: 1>, scalar_prefetch = 0 : i64, scratch_operands = 0 : i64, tpu.core_type = #tpu.core_type<tc>, window_params = [{transform_indices = @transform_0, window_bounds = array<i64: 16, 32>}, {pipeline_mode = #tpu.pipeline_mode<synchronous>, transform_indices = @transform_1, window_bounds = array<i64: 32, 128>}, {pipeline_mode = #tpu.pipeline_mode<synchronous>, transform_indices = @transform_2, window_bounds = array<i64: 1, 128>}, {pipeline_mode = #tpu.pipeline_mode<synchronous>, transform_indices = @transform_3, window_bounds = array<i64: 128, 128>}, {pipeline_mode = #tpu.pipeline_mode<synchronous>, transform_indices = @transform_4, window_bounds = array<i64: 1, 128>}, {pipeline_mode = #tpu.pipeline_mode<synchronous>, transform_indices = @transform_5, window_bounds = array<i64: 128, 128>}, {pipeline_mode = #tpu.pipeline_mode<synchronous>, transform_indices = @transform_6, window_bounds = array<i64: 1, 128>}, {transform_indices = @transform_7, window_bounds = array<i64: 16, 128>}]} {
    %c0 = arith.constant 0 : index
    %c0_0 = arith.constant 0 : index
    %0 = vector.load %arg1[%c0, %c0_0] : memref<16x32xf32, #tpu.memory_space<vmem>>, vector<16x32xf32>
    %1 = arith.truncf %0 : vector<16x32xf32> to vector<16x32xbf16>
    %c0_1 = arith.constant 0 : index
    %c0_2 = arith.constant 0 : index
    %2 = vector.load %arg2[%c0_1, %c0_2] : memref<32x128xbf16, #tpu.memory_space<vmem>>, vector<32x128xbf16>
    %cst = arith.constant dense<0.000000e+00> : vector<16x128xf32>
    %3 = tpu.matmul %1, %2, %cst {dimension_numbers = #tpu.dot_dimension_numbers<[1], [0], [0], [1], [0, 0, 1, 1], [], []>} : vector<16x32xbf16>, vector<32x128xbf16>, vector<16x128xf32> -> vector<16x128xf32>
    %c0_3 = arith.constant 0 : index
    %c0_4 = arith.constant 0 : index
    %4 = vector.load %arg3[%c0_3, %c0_4] : memref<1x128xf32, #tpu.memory_space<vmem>>, vector<1x128xf32>
    %5 = vector.broadcast %4 : vector<1x128xf32> to vector<16x128xf32>
    %6 = arith.addf %3, %5 : vector<16x128xf32>
    %cst_5 = arith.constant 0.000000e+00 : f32
    %7 = vector.broadcast %cst_5 : f32 to vector<16x128xf32>
    %8 = arith.maximumf %6, %7 : vector<16x128xf32>
    %9 = arith.truncf %8 : vector<16x128xf32> to vector<16x128xbf16>
    %c0_6 = arith.constant 0 : index
    %c0_7 = arith.constant 0 : index
    %10 = vector.load %arg4[%c0_6, %c0_7] : memref<128x128xbf16, #tpu.memory_space<vmem>>, vector<128x128xbf16>
    %cst_8 = arith.constant dense<0.000000e+00> : vector<16x128xf32>
    %11 = tpu.matmul %9, %10, %cst_8 {dimension_numbers = #tpu.dot_dimension_numbers<[1], [0], [0], [1], [0, 0, 1, 1], [], []>} : vector<16x128xbf16>, vector<128x128xbf16>, vector<16x128xf32> -> vector<16x128xf32>
    %c0_9 = arith.constant 0 : index
    %c0_10 = arith.constant 0 : index
    %12 = vector.load %arg5[%c0_9, %c0_10] : memref<1x128xf32, #tpu.memory_space<vmem>>, vector<1x128xf32>
    %13 = vector.broadcast %12 : vector<1x128xf32> to vector<16x128xf32>
    %14 = arith.addf %11, %13 : vector<16x128xf32>
    %cst_11 = arith.constant 0.000000e+00 : f32
    %15 = vector.broadcast %cst_11 : f32 to vector<16x128xf32>
    %16 = arith.maximumf %14, %15 : vector<16x128xf32>
    %17 = arith.truncf %16 : vector<16x128xf32> to vector<16x128xbf16>
    %c0_12 = arith.constant 0 : index
    %c0_13 = arith.constant 0 : index
    %18 = vector.load %arg6[%c0_12, %c0_13] : memref<128x128xbf16, #tpu.memory_space<vmem>>, vector<128x128xbf16>
    %cst_14 = arith.constant dense<0.000000e+00> : vector<16x128xf32>
    %19 = tpu.matmul %17, %18, %cst_14 {dimension_numbers = #tpu.dot_dimension_numbers<[1], [0], [0], [1], [0, 0, 1, 1], [], []>} : vector<16x128xbf16>, vector<128x128xbf16>, vector<16x128xf32> -> vector<16x128xf32>
    %c0_15 = arith.constant 0 : index
    %c0_16 = arith.constant 0 : index
    %20 = vector.load %arg7[%c0_15, %c0_16] : memref<1x128xf32, #tpu.memory_space<vmem>>, vector<1x128xf32>
    %21 = vector.broadcast %20 : vector<1x128xf32> to vector<16x128xf32>
    %22 = arith.addf %19, %21 : vector<16x128xf32>
    %23 = math.tanh %22 : vector<16x128xf32>
    %c0_17 = arith.constant 0 : index
    %c0_18 = arith.constant 0 : index
    %24 = vector.load %arg8[%c0_17, %c0_18] : memref<16x128xf32, #tpu.memory_space<vmem>>, vector<16x128xf32>
    tpu.vector_store %arg8[%c0_17, %c0_18], %23 {strides = array<i32>} : memref<16x128xf32, #tpu.memory_space<vmem>>, vector<16x128xf32>,
    return
  }
  func.func @transform_0(%arg0: i32) -> (i32, i32) {
    %c0_i32 = arith.constant 0 : i32
    %c0_i32_0 = arith.constant 0 : i32
    return %arg0, %c0_i32 : i32, i32
  }
  func.func @transform_1(%arg0: i32) -> (i32, i32) {
    %c0_i32 = arith.constant 0 : i32
    %c0_i32_0 = arith.constant 0 : i32
    %c0_i32_1 = arith.constant 0 : i32
    return %c0_i32, %c0_i32_0 : i32, i32
  }
  func.func @transform_2(%arg0: i32) -> (i32, i32) {
    %c0_i32 = arith.constant 0 : i32
    %c0_i32_0 = arith.constant 0 : i32
    %c0_i32_1 = arith.constant 0 : i32
    return %c0_i32, %c0_i32_0 : i32, i32
  }
  func.func @transform_3(%arg0: i32) -> (i32, i32) {
    %c0_i32 = arith.constant 0 : i32
    %c0_i32_0 = arith.constant 0 : i32
    %c0_i32_1 = arith.constant 0 : i32
    return %c0_i32, %c0_i32_0 : i32, i32
  }
  func.func @transform_4(%arg0: i32) -> (i32, i32) {
    %c0_i32 = arith.constant 0 : i32
    %c0_i32_0 = arith.constant 0 : i32
    %c0_i32_1 = arith.constant 0 : i32
    return %c0_i32, %c0_i32_0 : i32, i32
  }
  func.func @transform_5(%arg0: i32) -> (i32, i32) {
    %c0_i32 = arith.constant 0 : i32
    %c0_i32_0 = arith.constant 0 : i32
    %c0_i32_1 = arith.constant 0 : i32
    return %c0_i32, %c0_i32_0 : i32, i32
  }
  func.func @transform_6(%arg0: i32) -> (i32, i32) {
    %c0_i32 = arith.constant 0 : i32
    %c0_i32_0 = arith.constant 0 : i32
    %c0_i32_1 = arith.constant 0 : i32
    return %c0_i32, %c0_i32_0 : i32, i32
  }
  func.func @transform_7(%arg0: i32) -> (i32, i32) {
    %c0_i32 = arith.constant 0 : i32
    %c0_i32_0 = arith.constant 0 : i32
    return %arg0, %c0_i32 : i32, i32
  }
}

</mosaic_0001>

<bundles_post_ra>
// kernel: tpu_custom_call.1
= control target key start
LH: loop header
LB: loop body
LE: loop exit
PB: predicated region body
PF: predicated region fallthrough
CT: control target
= control target key end

     0   :  { %12 = vsyncpa [#allocation3], 0  ;;  %s815_s0 = inlined_call_operand.hbm [shape: f32[16,32], index: 0, kind: input, shape index: {}]   ;;  %s816_s1 = inlined_call_operand.hbm [shape: bf16[32,128], index: 1, kind: input, shape index: {}]   ;;  %s817_s2 = inlined_call_operand.vmem [shape: f32[1,128], index: 2, kind: input, shape index: {}]   ;;  %s818_s3 = inlined_call_operand.hbm [shape: bf16[128,128], index: 3, kind: input, shape index: {}]   ;;  %s819_s4 = inlined_call_operand.vmem [shape: f32[1,128], index: 4, kind: input, shape index: {}]   ;;  %s820_s5 = inlined_call_operand.hbm [shape: bf16[128,128], index: 5, kind: input, shape index: {}]   ;;  %s821_s6 = inlined_call_operand.vmem [shape: f32[1,128], index: 6, kind: input, shape index: {}]   ;;  %s822_s7 = inlined_call_operand.hbm [shape: f32[16,128], index: 7, kind: output, shape index: {}]  }
   0x1   :  { %13 = vsyncpa [#allocation6], 0 }
   0x2   :  { %14 = vsyncpa [#allocation9], 0 }
   0x3   :  { %15 = vsyncpa [#allocation4], 0  ;;  %s649_s24 = smov [#allocation5]   ;;  %s531_s28 = scalar_lea.hbm %s816_s1, 256 }
   0x4   :  { %s33_s25 = sshll.u32 %s649_s24, 4  ;;  %p532_p0 = scmp.ne.s32.totalorder %s816_s1, %s531_s28  ;;  %s34_s25 = int_to_ptr.vmem [resolvable:$true] %s33_s25 }
   0x5   :  { %p535_p1 = scmp.lt.u32.totalorder %s531_s28, %s816_s1 }
   0x7   :  { %p537_p2 = pnand %p535_p1, %p532_p0 }
   0x9   :  { %540 = shalt.err (!%p537_p2)
}
   0xa   :  { %s541_s10 = scalar_lea.vmem %s34_s25, 256  ;;  %p546_p4 = scmp.lt.s32.totalorder %s34_s25, %s34_s25 }
   0xb   :  { %p542_p3 = scmp.ne.s32.totalorder %s34_s25, %s541_s10  ;;  %p547_p5 = scmp.lt.s32.totalorder %s541_s10, %s541_s10 }
   0xd   :  { %p548_p6 = por %p547_p5, %p546_p4 }
   0xf   :  { %p549_p7 = pnand %p548_p6, %p542_p3 }
  0x11   :  { %552 = shalt.err (!%p549_p7)
}
  0x12   :  { %s650_s11 = smov 64   ;;  %s651_s12 = smov 4  }
  0x13   :  { %39 = dma.hbm_to_vmem [thread:$0]  %s816_s1, 256, %s34_s25, [#allocation6], %s650_s11, %s650_s11, %s651_s12  }
  0x14   :  { %s652_s15 = smov [#allocation2]   ;;  %s553_s19 = scalar_lea.hbm %s815_s0, 256 }
  0x15   :  { %s21_s16 = sshll.u32 %s652_s15, 4  ;;  %p554_p8 = scmp.ne.s32.totalorder %s815_s0, %s553_s19  ;;  %s22_s16 = int_to_ptr.vmem [resolvable:$true] %s21_s16 }
  0x16   :  { %p557_p9 = scmp.lt.u32.totalorder %s553_s19, %s815_s0 }
  0x18   :  { %p559_p10 = pnand %p557_p9, %p554_p8 }
  0x1a   :  { %562 = shalt.err (!%p559_p10)
}
  0x1b   :  { %s563_s24 = scalar_lea.vmem %s22_s16, 256  ;;  %p568_p12 = scmp.lt.s32.totalorder %s22_s16, %s22_s16 }
  0x1c   :  { %p564_p11 = scmp.ne.s32.totalorder %s22_s16, %s563_s24  ;;  %p569_p13 = scmp.lt.s32.totalorder %s563_s24, %s563_s24 }
  0x1e   :  { %p570_p0 = por %p569_p13, %p568_p12 }
  0x20   :  { %p571_p1 = pnand %p570_p0, %p564_p11 }
  0x22   :  { %574 = shalt.err (!%p571_p1)
}
  0x23   :  { %s653_s1 = smov 128   ;;  %s654_s25 = smov 8  }
  0x24   :  { %27 = dma.hbm_to_vmem [thread:$0]  %s815_s0, 256, %s22_s16, [#allocation3], %s653_s1, %s653_s1, %s654_s25  }
  0x25   :  { %s655_s28 = smov [#allocation7]   ;;  %s656_s30 = smov [#allocation8]  }
  0x26   :  { %s47_s29 = sshll.u32 %s655_s28, 4  ;;  %s61_s8 = sshll.u32 %s656_s30, 4  ;;  %s48_s29 = int_to_ptr.vmem [resolvable:$true] %s47_s29  ;;  %s730_s8 = int_to_ptr.vmem [resolvable:$true] %s61_s8 }
  0x27   :  { %s575_s13 = scalar_lea.hbm %s818_s3, 1024 }
  0x28   :  { %p576_p2 = scmp.ne.s32.totalorder %s818_s3, %s575_s13  ;;  %p579_p3 = scmp.lt.u32.totalorder %s575_s13, %s818_s3 }
  0x2a   :  { %p581_p4 = pnand %p579_p3, %p576_p2 }
  0x2c   :  { %584 = shalt.err (!%p581_p4)
}
  0x2d   :  { %s585_s0 = scalar_lea.vmem %s48_s29, 1024  ;;  %p590_p6 = scmp.lt.s32.totalorder %s48_s29, %s48_s29 }
  0x2e   :  { %p586_p5 = scmp.ne.s32.totalorder %s48_s29, %s585_s0  ;;  %p591_p7 = scmp.lt.s32.totalorder %s585_s0, %s585_s0 }
  0x30   :  { %p592_p8 = por %p591_p7, %p590_p6 }
  0x32   :  { %p593_p9 = pnand %p592_p8, %p586_p5 }
  0x34   :  { %596 = shalt.err (!%p593_p9)
}
  0x35   :  { %53 = dma.hbm_to_vmem [thread:$0]  %s818_s3, 1024, %s48_s29, [#allocation6], %s650_s11, %s650_s11, %s651_s12  }
  0x36   :  { %s597_s22 = scalar_lea.hbm %s820_s5, 1024 }
  0x37   :  { %p598_p10 = scmp.ne.s32.totalorder %s820_s5, %s597_s22  ;;  %p601_p11 = scmp.lt.u32.totalorder %s597_s22, %s820_s5 }
  0x39   :  { %p603_p12 = pnand %p601_p11, %p598_p10 }
  0x3b   :  { %606 = shalt.err (!%p603_p12)
}
  0x3c   :  { %s607_s28 = scalar_lea.vmem %s730_s8, 1024  ;;  %p612_p0 = scmp.lt.s32.totalorder %s730_s8, %s730_s8 }
  0x3d   :  { %p608_p13 = scmp.ne.s32.totalorder %s730_s8, %s607_s28  ;;  %p613_p1 = scmp.lt.s32.totalorder %s607_s28, %s607_s28 }
  0x3f   :  { %p614_p2 = por %p613_p1, %p612_p0 }
  0x41   :  { %p615_p3 = pnand %p614_p2, %p608_p13 }
  0x43   :  { %618 = shalt.err (!%p615_p3)
}
  0x44   :  { %67 = dma.hbm_to_vmem [thread:$0]  %s820_s5, 1024, %s730_s8, [#allocation9], %s650_s11, %s650_s11, %s651_s12  }
  0x45   :  { %641 = dma.done.wait [#allocation3], 256  }
  0x46   :  { %642 = vsyncadd [#allocation3], 4294967040 }
  0x47   :  { %643 = dma.done.wait [#allocation6], 1280  }
  0x48   :  { %644 = vsyncadd [#allocation6], 4294966016 }
  0x49   :  { %645 = dma.done.wait [#allocation9], 1024  }
  0x4a   :  { %646 = vsyncadd [#allocation9], 4294966272  ;;  %v657_v0 = vmov 0.0   ;;  %vm658_vm0 = vmmov 0   ;;  %v509_v1 = vld [vmem:[#allocation5] sm:$0xff]   ;;  %v510_v2 = vld [vmem:[#allocation5 + $0x8] sm:$0xff]  }
  0x4b   :  { %450 = vmatprep.subr.bf16.mxu0 %v657_v0  ;;  %454 = vmatprep.mubr.msk.bf16.mxu0 %vm658_vm0, %v657_v0  ;;  %v83_v3 = vld [vmem:[#allocation2] sm:$0xff]  ;;  %v84_v4 = vld [vmem:[#allocation2 + $0x8] sm:$0xff]  ;;  %vm109_vm1 = vcmask 261120   ;;  %v513_v8 = vld [vmem:[#allocation7 + $0x10] sm:$0xff]  }
  0x4c   :  { %458 = vmatprep.subr.bf16.mxu1 %v657_v0  ;;  %474 = vmatprep.mubr.msk.bf16.mxu1 %vm658_vm0, %v657_v0  ;;  %v511_v5 = vld [vmem:[#allocation7] sm:$0xff]   ;;  %v85_v6 = vpack.c.bf16 %v84_v4, %v83_v3  ;;  %v512_v7 = vld [vmem:[#allocation7 + $0x8] sm:$0xff]   ;;  %v514_v9 = vld [vmem:[#allocation7 + $0x18] sm:$0xff]  }
  0x4d   :  { %451 = vmatpush3.bf16.msra.mxu0 %v509_v1  ;;  %459 = vmatpush3.bf16.msra.mxu1 %v511_v5  ;;  %v515_v10 = vld [vmem:[#allocation7 + $0x20] sm:$0xff]   ;;  %v516_v11 = vld [vmem:[#allocation7 + $0x28] sm:$0xff]   ;;  %v517_v12 = vld [vmem:[#allocation7 + $0x30] sm:$0xff]  }
  0x4e   :  { %452 = vmatprep.subr.bf16.mxu0 %v657_v0  ;;  %460 = vmatprep.subr.bf16.mxu1 %v657_v0  ;;  %v518_v13 = vld [vmem:[#allocation7 + $0x38] sm:$0xff]   ;;  %v519_v14 = vld [vmem:[#allocation8] sm:$0xff]   ;;  %v520_v15 = vld [vmem:[#allocation8 + $0x8] sm:$0xff]  }
  0x4f   :  { %v521_v16 = vld [vmem:[#allocation8 + $0x10] sm:$0xff]   ;;  %v522_v17 = vld [vmem:[#allocation8 + $0x18] sm:$0xff]   ;;  %v523_v18 = vld [vmem:[#allocation8 + $0x20] sm:$0xff]  }
  0x50   :  { %v524_v19 = vld [vmem:[#allocation8 + $0x28] sm:$0xff]   ;;  %v407_v20 = vld [vmem:[%s817_s2] ss:$0 sm:$0xff]  ;;  %v525_v30 = vld [vmem:[#allocation8 + $0x30] sm:$0xff]  }
  0x51   :  { %453 = vmatpush3.bf16.msra.mxu0 %v510_v2  ;;  %461 = vmatpush3.bf16.msra.mxu1 %v512_v7  ;;  %v526_v31 = vld [vmem:[#allocation8 + $0x38] sm:$0xff]   ;;  %v411_v32 = vld [vmem:[%s819_s4] ss:$0 sm:$0xff]  ;;  %s659_s4 = smov [#allocation10]  }
  0x52   :  { %478 = vmatprep.subr.bf16.mxu0 %v657_v0  ;;  %462 = vmatprep.subr.bf16.mxu1 %v657_v0  ;;  %v420_v42 = vld [vmem:[%s821_s6] ss:$0 sm:$0xff]  ;;  %s393_s9 = sshll.u32 %s659_s4, 4  ;;  %s394_s9 = int_to_ptr.vmem [resolvable:$true] %s393_s9 }
  0x53   :  { %s619_s10 = scalar_lea.vmem %s394_s9, 256  ;;  %p624_p5 = scmp.lt.s32.totalorder %s394_s9, %s394_s9 }
  0x54   :  { %455 = vmatmul.mubr.msk.bf16.vlgmr.msra.gmra.mrb[0].mxu0 %vm109_vm1, %v85_v6  ;;  %p620_p4 = scmp.ne.s32.totalorder %s394_s9, %s619_s10  ;;  %p625_p6 = scmp.lt.s32.totalorder %s619_s10, %s619_s10 }
  0x55   :  { %494 = vmatprep.mubr.msk.bf16.mxu0 %vm658_vm0, %v657_v0  ;;  %463 = vmatpush3.bf16.msra.mxu1 %v513_v8 }
  0x56   :  { %464 = vmatprep.subr.bf16.mxu1 %v657_v0  ;;  %479 = vmatpush3.bf16.msra.mxu0 %v519_v14  ;;  %p626_p7 = por %p625_p6, %p624_p5 }
  0x57   :  { %480 = vmatprep.subr.bf16.mxu0 %v657_v0 }
  0x58   :  { %p627_p8 = pnand %p626_p7, %p620_p4 }
  0x59   :  { %465 = vmatpush3.bf16.msra.mxu1 %v514_v9 }
  0x5a   :  { %466 = vmatprep.subr.bf16.mxu1 %v657_v0  ;;  %481 = vmatpush3.bf16.msra.mxu0 %v520_v15 }
  0x5b   :  { %482 = vmatprep.subr.bf16.mxu0 %v657_v0 }
  0x5d   :  { %467 = vmatpush3.bf16.msra.mxu1 %v515_v10 }
  0x5e   :  { %468 = vmatprep.subr.bf16.mxu1 %v657_v0  ;;  %483 = vmatpush3.bf16.msra.mxu0 %v521_v16 }
  0x5f   :  { %484 = vmatprep.subr.bf16.mxu0 %v657_v0 }
  0x61   :  { %469 = vmatpush3.bf16.msra.mxu1 %v516_v11 }
  0x62   :  { %470 = vmatprep.subr.bf16.mxu1 %v657_v0  ;;  %485 = vmatpush3.bf16.msra.mxu0 %v522_v17 }
  0x63   :  { %486 = vmatprep.subr.bf16.mxu0 %v657_v0 }
  0x65   :  { %471 = vmatpush3.bf16.msra.mxu1 %v517_v12 }
  0x66   :  { %472 = vmatprep.subr.bf16.mxu1 %v657_v0  ;;  %487 = vmatpush3.bf16.msra.mxu0 %v523_v18 }
  0x67   :  { %488 = vmatprep.subr.bf16.mxu0 %v657_v0 }
  0x69   :  { %473 = vmatpush3.bf16.msra.mxu1 %v518_v13 }
  0x6a   :  { %489 = vmatpush3.bf16.msra.mxu0 %v524_v19 }
  0x6b   :  { %490 = vmatprep.subr.bf16.mxu0 %v657_v0 }
  0x6e   :  { %491 = vmatpush3.bf16.msra.mxu0 %v525_v30 }
  0x6f   :  { %492 = vmatprep.subr.bf16.mxu0 %v657_v0 }
  0x72   :  { %493 = vmatpush3.bf16.msra.mxu0 %v526_v31 }
 0x127   :  { %v147_v21 = vpop.f32.mrb[0].mxu0 }
 0x128   :  { %v148_v22 = vadd.f32 %v407_v20, %v147_v21  ;;  %v456_v23 = vpop.f32.mrb[1].mxu0 }
 0x129   :  { %v150_v24 = vpop.f32.mrb[2].mxu0 }
 0x12a   :  { %v151_v25 = vadd.f32 %v407_v20, %v150_v24  ;;  %v457_v26 = vpop.f32.mrb[3].mxu0  ;;  %v154_v27 = vmax.f32 %v148_v22, 0.0 }
 0x12c   :  { %v155_v28 = vmax.f32 %v151_v25, 0.0 }
 0x12e   :  { %v156_v29 = vpack.c.bf16 %v155_v28, %v154_v27 }
 0x130   :  { %475 = vmatmul.mubr.bf16.vlgmr.msra.gmra.mrb[0].mxu1 %v156_v29 }
 0x203   :  { %v262_v33 = vpop.f32.mrb[0].mxu1 }
 0x204   :  { %v263_v34 = vadd.f32 %v411_v32, %v262_v33  ;;  %v476_v35 = vpop.f32.mrb[1].mxu1 }
 0x205   :  { %v265_v36 = vpop.f32.mrb[2].mxu1 }
 0x206   :  { %v266_v37 = vadd.f32 %v411_v32, %v265_v36  ;;  %v477_v38 = vpop.f32.mrb[3].mxu1  ;;  %v269_v39 = vmax.f32 %v263_v34, 0.0 }
 0x208   :  { %v270_v40 = vmax.f32 %v266_v37, 0.0 }
 0x20a   :  { %v271_v41 = vpack.c.bf16 %v270_v40, %v269_v39 }
 0x20c   :  { %495 = vmatmul.mubr.bf16.vlgmr.msra.gmra.mrb[4].mxu0 %v271_v41 }
 0x2df   :  { %v377_v43 = vpop.f32.mrb[4].mxu0 }
 0x2e0   :  { %v378_v44 = vadd.f32 %v420_v42, %v377_v43  ;;  %v496_v45 = vpop.f32.mrb[5].mxu0 }
 0x2e1   :  { %v380_v46 = vpop.f32.mrb[6].mxu0 }
 0x2e2   :  { %527 = vtanh.f32 %v378_v44  ;;  %v381_v47 = vadd.f32 %v420_v42, %v380_v46  ;;  %v497_v48 = vpop.f32.mrb[7].mxu0 }
 0x2e4   :  { %529 = vtanh.f32 %v381_v47 }
 0x2ec   :  { %v528_v49 = vpop.eup %527 }
 0x2ed   :  { %386 = vst [vmem:[#allocation10] sm:$0xff] %v528_v49 }
 0x2ee   :  { %v530_v50 = vpop.eup %529 }
 0x2ef   :  { %387 = vst [vmem:[#allocation10 + $0x8] sm:$0xff] %v530_v50 }
 0x2f0   :  { %630 = shalt.err (!%p627_p8)
}
 0x2f1   :  { %s631_s14 = scalar_lea.hbm %s822_s7, 256 }
 0x2f2   :  { %p632_p9 = scmp.ne.s32.totalorder %s822_s7, %s631_s14  ;;  %p635_p10 = scmp.lt.u32.totalorder %s631_s14, %s822_s7 }
 0x2f4   :  { %p637_p11 = pnand %p635_p10, %p632_p9 }
 0x2f6   :  { %640 = shalt.err (!%p637_p11)
}
 0x2f7   :  { %399 = dma.vmem_to_hbm [thread:$0]  %s394_s9, 256, %s822_s7, [#allocation4], %s653_s1, %s653_s1, %s654_s25  }
 0x2f8   :  { %647 = dma.done.wait [#allocation4], 256  }
 0x2f9   :  { %648 = vsyncadd [#allocation4], 4294967040 }
 0x2fa   :  { %403 = vsyncpa [#allocation3], 1 }
 0x2fb   :  { %404 = vsyncpa [#allocation6], 1 }
 0x2fc   :  { %405 = vsyncpa [#allocation9], 1 }
 0x2fd   :  { %406 = vsyncpa [#allocation4], 1 }

</bundles_post_ra>
